<compile_context>
chip_gen: v6e
topology: v6e:2x2x1
jax: 0.10.0
libtpu: 0.0.40
codegen_flags: <defaults>
</compile_context>

<pallas_src>
import functools

import jax
import jax.numpy as jnp
from jax import lax
from jax.experimental import pallas as pl
from jax.experimental.pallas import tpu as pltpu


def _round_up(x, m):
    return ((x + m - 1) // m) * m


def _mlp_head_kernel(x_ref, w1_ref, gamma_ref, beta_ref, w2_ref, b2_ref,
                     o_ref, acc_ref, *, inv_b, eps):
    k = pl.program_id(1)

    @pl.when(k == 0)
    def _init():
        acc_ref[...] = jnp.zeros_like(acc_ref)

    # --- Linear 1 on this H-slab (MXU, f32 accumulation). b1 is cancelled by BN. ---
    h = jnp.dot(x_ref[...], w1_ref[...], preferred_element_type=jnp.float32)  # (B, th)

    # --- BatchNorm1d (training mode) stats in a single pass over the resident batch ---
    s1 = jnp.sum(h, axis=0, keepdims=True)                  # (1, th)
    s2 = jnp.sum(h * h, axis=0, keepdims=True)              # (1, th)
    mean = s1 * inv_b
    var = jnp.maximum(s2 * inv_b - mean * mean, 0.0)        # biased variance
    scale = gamma_ref[...].astype(jnp.float32) * lax.rsqrt(var + eps)
    shift = beta_ref[...].astype(jnp.float32) - mean * scale

    # --- folded BN affine + ReLU: one FMA + one max per element ---
    h = jnp.maximum(h * scale + shift, 0.0)

    # --- Linear 2 partial product, accumulated across H-slabs ---
    acc_ref[...] += jnp.dot(h.astype(w2_ref.dtype), w2_ref[...],
                            preferred_element_type=jnp.float32)

    @pl.when(k == pl.num_programs(1) - 1)
    def _finalize():
        o_ref[...] = (acc_ref[...]
                      + b2_ref[...].astype(jnp.float32)).astype(o_ref.dtype)


def mlp_head(x, w1, b1, gamma, beta, w2, b2, *, th=512, tp=128):
    """x:(B,C), w1:(C,H), gamma/beta:(H,) or (1,H), w2:(H,P), b2:(1,P) or (P,)."""
    # b1 accepted for API parity with nn.Linear; training-mode BatchNorm subtracts the
    # batch mean, which cancels a per-feature bias exactly, so it is never loaded.
    del b1

    B, C = x.shape
    H = w1.shape[1]
    P = w2.shape[1]

    gamma = gamma.reshape(1, H)
    beta = beta.reshape(1, H)
    b2 = b2.reshape(1, P)

    # Tile sizes: lane-aligned (multiples of 128); H padded to a multiple of th,
    # P padded to a multiple of tp so output stores are unmasked, lane-dense.
    th = min(th, _round_up(H, 128))
    H_pad = _round_up(H, th)
    P_pad = _round_up(P, tp)

    if H_pad != H:
        # Padded hidden features: w1 cols / gamma / beta zero -> slab contributes 0.
        w1 = jnp.pad(w1, ((0, 0), (0, H_pad - H)))
        gamma = jnp.pad(gamma, ((0, 0), (0, H_pad - H)))
        beta = jnp.pad(beta, ((0, 0), (0, H_pad - H)))
        w2 = jnp.pad(w2, ((0, H_pad - H), (0, 0)))
    if P_pad != P:
        w2 = jnp.pad(w2, ((0, 0), (0, P_pad - P)))
        b2 = jnp.pad(b2, ((0, 0), (0, P_pad - P)))

    grid = (P_pad // tp, H_pad // th)   # (output tiles: parallel, H reduction: arbitrary)

    kernel = functools.partial(_mlp_head_kernel, inv_b=1.0 / B, eps=1e-5)

    out = pl.pallas_call(
        kernel,
        out_shape=jax.ShapeDtypeStruct((B, P_pad), x.dtype),
        grid_spec=pltpu.PrefetchScalarGridSpec(
            num_scalar_prefetch=0,
            grid=grid,
            in_specs=[
                pl.BlockSpec((B, C), lambda j, k: (0, 0)),    # x: resident, no re-DMA
                pl.BlockSpec((C, th), lambda j, k: (0, k)),   # w1 H-slab
                pl.BlockSpec((1, th), lambda j, k: (0, k)),   # gamma slab
                pl.BlockSpec((1, th), lambda j, k: (0, k)),   # beta slab
                pl.BlockSpec((th, tp), lambda j, k: (k, j)),  # w2 slab
                pl.BlockSpec((1, tp), lambda j, k: (0, j)),   # b2 tile
            ],
            out_specs=pl.BlockSpec((B, tp), lambda j, k: (0, j)),
            scratch_shapes=[pltpu.VMEM((B, tp), jnp.float32)],
        ),
        compiler_params=pltpu.CompilerParams(
            dimension_semantics=("parallel", "arbitrary"),
            # Explicit scoped-VMEM budget: above the 16/32 MiB defaults, with headroom
            # under v7x's 64 MiB physical VMEM.
            vmem_limit_bytes=48 * 1024 * 1024,
        ),
    )(x, w1, gamma, beta, w2, b2)

    return out[:, :P]


def mlp_head_ref(x, w1, b1, gamma, beta, w2, b2):
    """Pure-JAX reference, faithful to the PyTorch module (training-mode BN)."""
    h = x @ w1 + b1
    mean = jnp.mean(h, axis=0, keepdims=True)
    var = jnp.mean((h - mean) ** 2, axis=0, keepdims=True)
    h = (h - mean) / jnp.sqrt(var + 1e-5) * gamma.reshape(1, -1) + beta.reshape(1, -1)
    h = jnp.maximum(h, 0.0)
    return h @ w2 + b2.reshape(1, -1)


if __name__ == "__main__":
    # Small shapes consistent with MLPHead(in_channels=C, projection_size=P,
    # mlp_hidden_size=H).  H=256 with th=128 exercises multi-slab accumulation;
    # P=16 exercises the lane-dense output padding path.
    B, C, H, P = 8, 32, 256, 16

    key = jax.random.PRNGKey(0)
    kx, kw1, kb1, kg, kbt, kw2, kb2 = jax.random.split(key, 7)

    x = jax.random.normal(kx, (B, C), dtype=jnp.float32)

    bound1 = 1.0 / (C ** 0.5)
    w1 = jax.random.uniform(kw1, (C, H), jnp.float32, -bound1, bound1)
    b1 = jax.random.uniform(kb1, (1, H), jnp.float32, -bound1, bound1)
    # BatchNorm affine (perturbed from the 1/0 init so the folded affine is exercised).
    gamma = 1.0 + 0.1 * jax.random.normal(kg, (1, H), dtype=jnp.float32)
    beta = 0.1 * jax.random.normal(kbt, (1, H), dtype=jnp.float32)
    bound2 = 1.0 / (H ** 0.5)
    w2 = jax.random.uniform(kw2, (H, P), jnp.float32, -bound2, bound2)
    b2 = jax.random.uniform(kb2, (1, P), jnp.float32, -bound2, bound2)

    out = mlp_head(x, w1, b1, gamma, beta, w2, b2, th=128, tp=128)
    out = jax.block_until_ready(out)

    ref = mlp_head_ref(x, w1, b1, gamma, beta, w2, b2)
    assert out.shape == (B, P)
    assert out.dtype == x.dtype
    assert jnp.allclose(out, ref, atol=1e-3, rtol=1e-3), "mismatch vs reference"

    print("KERNEL_OK")
</pallas_src>

<mosaic_0001>
module attributes {stable_mosaic.version = 11 : i64} {
  func.func @_mlp_head_kernel(%arg0: i32, %arg1: i32, %arg2: memref<8x32xf32, #tpu.memory_space<vmem>>, %arg3: memref<32x128xf32, #tpu.memory_space<vmem>>, %arg4: memref<1x128xf32, #tpu.memory_space<vmem>>, %arg5: memref<1x128xf32, #tpu.memory_space<vmem>>, %arg6: memref<128x128xf32, #tpu.memory_space<vmem>>, %arg7: memref<1x128xf32, #tpu.memory_space<vmem>>, %arg8: memref<8x128xf32, #tpu.memory_space<vmem>>, %arg9: memref<8x128xf32, #tpu.memory_space<vmem>>) attributes {dimension_semantics = [#tpu.dimension_semantics<parallel>, #tpu.dimension_semantics<arbitrary>], iteration_bounds = array<i64: 1, 2>, scalar_prefetch = 0 : i64, scratch_operands = 1 : i64, tpu.core_type = #tpu.core_type<tc>, window_params = [{pipeline_mode = #tpu.pipeline_mode<synchronous>, transform_indices = @transform_0, window_bounds = array<i64: 8, 32>}, {transform_indices = @transform_1, window_bounds = array<i64: 32, 128>}, {transform_indices = @transform_2, window_bounds = array<i64: 1, 128>}, {transform_indices = @transform_3, window_bounds = array<i64: 1, 128>}, {transform_indices = @transform_4, window_bounds = array<i64: 128, 128>}, {transform_indices = @transform_5, window_bounds = array<i64: 1, 128>}, {transform_indices = @transform_6, window_bounds = array<i64: 8, 128>}]} {
    %c0_i32 = arith.constant 0 : i32
    %0 = arith.cmpi eq, %arg1, %c0_i32 : i32
    %1 = arith.extui %0 : i1 to i32
    %c0_i32_0 = arith.constant 0 : i32
    %2 = arith.cmpi ne, %1, %c0_i32_0 : i32
    scf.if %2 {
      %cst_23 = arith.constant 0.000000e+00 : f32
      %41 = vector.broadcast %cst_23 : f32 to vector<8x128xf32>
      %c0_24 = arith.constant 0 : index
      %c0_25 = arith.constant 0 : index
      %42 = vector.load %arg9[%c0_24, %c0_25] : memref<8x128xf32, #tpu.memory_space<vmem>>, vector<8x128xf32>
      tpu.vector_store %arg9[%c0_24, %c0_25], %41 {strides = array<i32>} : memref<8x128xf32, #tpu.memory_space<vmem>>, vector<8x128xf32>,
    } else {
    }
    %c0 = arith.constant 0 : index
    %c0_1 = arith.constant 0 : index
    %3 = vector.load %arg2[%c0, %c0_1] : memref<8x32xf32, #tpu.memory_space<vmem>>, vector<8x32xf32>
    %c0_2 = arith.constant 0 : index
    %c0_3 = arith.constant 0 : index
    %4 = vector.load %arg3[%c0_2, %c0_3] : memref<32x128xf32, #tpu.memory_space<vmem>>, vector<32x128xf32>
    %cst = arith.constant dense<0.000000e+00> : vector<8x128xf32>
    %5 = tpu.matmul %3, %4, %cst {dimension_numbers = #tpu.dot_dimension_numbers<[1], [0], [0], [1], [0, 0, 1, 1], [], []>} : vector<8x32xf32>, vector<32x128xf32>, vector<8x128xf32> -> vector<8x128xf32>
    %cst_4 = arith.constant dense<0.000000e+00> : vector<128xf32>
    %6 = vector.multi_reduction <add>, %5, %cst_4 [0] : vector<8x128xf32> to vector<128xf32>
    %7 = vector.shape_cast %6 : vector<128xf32> to vector<1x128xf32>
    %8 = arith.mulf %5, %5 : vector<8x128xf32>
    %cst_5 = arith.constant dense<0.000000e+00> : vector<128xf32>
    %9 = vector.multi_reduction <add>, %8, %cst_5 [0] : vector<8x128xf32> to vector<128xf32>
    %10 = vector.shape_cast %9 : vector<128xf32> to vector<1x128xf32>
    %cst_6 = arith.constant 1.250000e-01 : f32
    %11 = vector.broadcast %cst_6 : f32 to vector<1x128xf32>
    %12 = arith.mulf %7, %11 : vector<1x128xf32>
    %cst_7 = arith.constant 1.250000e-01 : f32
    %13 = vector.broadcast %cst_7 : f32 to vector<1x128xf32>
    %14 = arith.mulf %10, %13 : vector<1x128xf32>
    %15 = arith.mulf %12, %12 : vector<1x128xf32>
    %16 = arith.subf %14, %15 : vector<1x128xf32>
    %cst_8 = arith.constant 0.000000e+00 : f32
    %17 = vector.broadcast %cst_8 : f32 to vector<1x128xf32>
    %18 = arith.maximumf %16, %17 : vector<1x128xf32>
    %c0_9 = arith.constant 0 : index
    %c0_10 = arith.constant 0 : index
    %19 = vector.load %arg4[%c0_9, %c0_10] : memref<1x128xf32, #tpu.memory_space<vmem>>, vector<1x128xf32>
    %cst_11 = arith.constant 9.99999974E-6 : f32
    %20 = vector.broadcast %cst_11 : f32 to vector<1x128xf32>
    %21 = arith.addf %18, %20 : vector<1x128xf32>
    %22 = math.rsqrt %21 : vector<1x128xf32>
    %23 = arith.mulf %19, %22 : vector<1x128xf32>
    %c0_12 = arith.constant 0 : index
    %c0_13 = arith.constant 0 : index
    %24 = vector.load %arg5[%c0_12, %c0_13] : memref<1x128xf32, #tpu.memory_space<vmem>>, vector<1x128xf32>
    %25 = arith.mulf %12, %23 : vector<1x128xf32>
    %26 = arith.subf %24, %25 : vector<1x128xf32>
    %27 = vector.broadcast %23 : vector<1x128xf32> to vector<8x128xf32>
    %28 = arith.mulf %5, %27 : vector<8x128xf32>
    %29 = vector.broadcast %26 : vector<1x128xf32> to vector<8x128xf32>
    %30 = arith.addf %28, %29 : vector<8x128xf32>
    %cst_14 = arith.constant 0.000000e+00 : f32
    %31 = vector.broadcast %cst_14 : f32 to vector<8x128xf32>
    %32 = arith.maximumf %30, %31 : vector<8x128xf32>
    %c0_15 = arith.constant 0 : index
    %c0_16 = arith.constant 0 : index
    %33 = vector.load %arg9[%c0_15, %c0_16] : memref<8x128xf32, #tpu.memory_space<vmem>>, vector<8x128xf32>
    %c0_17 = arith.constant 0 : index
    %c0_18 = arith.constant 0 : index
    %34 = vector.load %arg6[%c0_17, %c0_18] : memref<128x128xf32, #tpu.memory_space<vmem>>, vector<128x128xf32>
    %cst_19 = arith.constant dense<0.000000e+00> : vector<8x128xf32>
    %35 = tpu.matmul %32, %34, %cst_19 {dimension_numbers = #tpu.dot_dimension_numbers<[1], [0], [0], [1], [0, 0, 1, 1], [], []>} : vector<8x128xf32>, vector<128x128xf32>, vector<8x128xf32> -> vector<8x128xf32>
    %36 = arith.addf %33, %35 : vector<8x128xf32>
    %c0_20 = arith.constant 0 : index
    %c0_21 = arith.constant 0 : index
    %37 = vector.load %arg9[%c0_20, %c0_21] : memref<8x128xf32, #tpu.memory_space<vmem>>, vector<8x128xf32>
    tpu.vector_store %arg9[%c0_20, %c0_21], %36 {strides = array<i32>} : memref<8x128xf32, #tpu.memory_space<vmem>>, vector<8x128xf32>,
    %c1_i32 = arith.constant 1 : i32
    %38 = arith.cmpi eq, %arg1, %c1_i32 : i32
    %39 = arith.extui %38 : i1 to i32
    %c0_i32_22 = arith.constant 0 : i32
    %40 = arith.cmpi ne, %39, %c0_i32_22 : i32
    scf.if %40 {
      %c0_23 = arith.constant 0 : index
      %c0_24 = arith.constant 0 : index
      %41 = vector.load %arg9[%c0_23, %c0_24] : memref<8x128xf32, #tpu.memory_space<vmem>>, vector<8x128xf32>
      %c0_25 = arith.constant 0 : index
      %c0_26 = arith.constant 0 : index
      %42 = vector.load %arg7[%c0_25, %c0_26] : memref<1x128xf32, #tpu.memory_space<vmem>>, vector<1x128xf32>
      %43 = vector.broadcast %42 : vector<1x128xf32> to vector<8x128xf32>
      %44 = arith.addf %41, %43 : vector<8x128xf32>
      %c0_27 = arith.constant 0 : index
      %c0_28 = arith.constant 0 : index
      %45 = vector.load %arg8[%c0_27, %c0_28] : memref<8x128xf32, #tpu.memory_space<vmem>>, vector<8x128xf32>
      tpu.vector_store %arg8[%c0_27, %c0_28], %44 {strides = array<i32>} : memref<8x128xf32, #tpu.memory_space<vmem>>, vector<8x128xf32>,
    } else {
    }
    return
  }
  func.func @transform_0(%arg0: i32, %arg1: i32) -> (i32, i32) {
    %c0_i32 = arith.constant 0 : i32
    %c0_i32_0 = arith.constant 0 : i32
    %c0_i32_1 = arith.constant 0 : i32
    return %c0_i32, %c0_i32_0 : i32, i32
  }
  func.func @transform_1(%arg0: i32, %arg1: i32) -> (i32, i32) {
    %c0_i32 = arith.constant 0 : i32
    %c0_i32_0 = arith.constant 0 : i32
    return %c0_i32, %arg1 : i32, i32
  }
  func.func @transform_2(%arg0: i32, %arg1: i32) -> (i32, i32) {
    %c0_i32 = arith.constant 0 : i32
    %c0_i32_0 = arith.constant 0 : i32
    return %c0_i32, %arg1 : i32, i32
  }
  func.func @transform_3(%arg0: i32, %arg1: i32) -> (i32, i32) {
    %c0_i32 = arith.constant 0 : i32
    %c0_i32_0 = arith.constant 0 : i32
    return %c0_i32, %arg1 : i32, i32
  }
  func.func @transform_4(%arg0: i32, %arg1: i32) -> (i32, i32) {
    %c0_i32 = arith.constant 0 : i32
    return %arg1, %arg0 : i32, i32
  }
  func.func @transform_5(%arg0: i32, %arg1: i32) -> (i32, i32) {
    %c0_i32 = arith.constant 0 : i32
    %c0_i32_0 = arith.constant 0 : i32
    return %c0_i32, %arg0 : i32, i32
  }
  func.func @transform_6(%arg0: i32, %arg1: i32) -> (i32, i32) {
    %c0_i32 = arith.constant 0 : i32
    %c0_i32_0 = arith.constant 0 : i32
    return %c0_i32, %arg0 : i32, i32
  }
}

</mosaic_0001>

<bundles_post_ra>
// kernel: tpu_custom_call.1
= control target key start
LH: loop header
LB: loop body
LE: loop exit
PB: predicated region body
PF: predicated region fallthrough
CT: control target
= control target key end

     0   :  { %11 = vsyncpa [#allocation4], 0  ;;  %s1344_s0 = inlined_call_operand.hbm [shape: f32[8,32], index: 0, kind: input, shape index: {}]   ;;  %s1345_s1 = inlined_call_operand.hbm [shape: f32[32,256], index: 1, kind: input, shape index: {}]   ;;  %s1346_s2 = inlined_call_operand.vmem [shape: f32[1,256], index: 2, kind: input, shape index: {}]   ;;  %s1347_s3 = inlined_call_operand.vmem [shape: f32[1,256], index: 3, kind: input, shape index: {}]   ;;  %s1348_s4 = inlined_call_operand.hbm [shape: f32[256,128], index: 4, kind: input, shape index: {}]   ;;  %s1349_s5 = inlined_call_operand.vmem [shape: f32[1,128], index: 5, kind: input, shape index: {}]   ;;  %s1350_s6 = inlined_call_operand.hbm [shape: f32[8,128], index: 6, kind: output, shape index: {}]  }
   0x1   :  { %12 = vsyncpa [#allocation7], 0 }
   0x2   :  { %14 = vsyncpa [#allocation7 + $0x1], 0 }
   0x3   :  { %15 = vsyncpa [#allocation5], 0  ;;  %s1119_s21 = smov 0   ;;  %s1121_s22 = smov 0  }
   0x4   :  { %s1123_s23 = smov 0   ;;  %s1125_s24 = smov 0  }
   0x5   :  { %s1127_s25 = smov 0   ;;  %s1129_s26 = smov 0  }
   0x6 LB: > { %s30_s27 = sadd.s32 1, %s1068_s25  ;;  %s61_s28 = sadd.s32 1, %s1060_s23  ;;  %s1072_s26 = sphi %s1129_s26, %s21_s26   ;;  %s1068_s25 = sphi %s1127_s25, %s1367_s25   ;;  %s1064_s24 = sphi %s1125_s24, %s1366_s24   ;;  %s1060_s23 = sphi %s1123_s23, %s1365_s23   ;;  %s1056_s22 = sphi %s1121_s22, %s1364_s22   ;;  %s1052_s21 = sphi %s1119_s21, %s1363_s21  }
   0x7   : > { %p31_p0 = scmp.ge.s32.totalorder %s30_s27, 2  ;;  %p68_p1 = scmp.ne.s32.totalorder %s1060_s23, %s1056_s22 }
   0x8   : > { %p69_p2 = scmp.eq.s32.totalorder %s1072_s26, 0  ;;  %p846_p4 = scmp.lt.s32.totalorder %s1072_s26, 2 }
   0x9   : > { %s1369_s27 = smov (%p31_p0, %s30_s27), 0  ;;  %s247_s30 = sand.u32 1, %s1072_s26  }
   0xa   : > { %p70_p3 = por %p69_p2, %p68_p1  ;;  %s58_s29 = ssub.s32 %s1068_s25, %s1369_s27 }
   0xb   : > { %p59_p5 = scmp.eq.s32.totalorder %s58_s29, 0  ;;  %s249_s7 = sand.u32 1, %s1060_s23  }
   0xc   : > { %s737_s8 = sshll.u32 %s1068_s25, 7  ;;  %s736_s10 = sshll.u32 %s249_s7, 5 }
   0xd   : > { %s1163_s9 = scalar_select %p59_p5, %s1060_s23, %s61_s28  }
   0xe   : > { %s256_s13 = scalar_lea.hbm %s1345_s1, %s737_s8  ;;  %p1170_p6 = pnand %p846_p4, %p70_p3 }
   0xf   : > { %s251_s15 = scalar_lea.vmem [#allocation6], %s736_s10  ;;  %s1174_s17 = scalar_lea.sflag [#allocation7], %s247_s30 }
  0x10   : > { %s257_s16 = sshll.u32 %s251_s15, 4  ;;  %p1352_p7 = pneg %p1170_p6  ;;  %s258_s16 = int_to_ptr.vmem [resolvable:$true] %s257_s16 }
  0x11   : > { %s921_s18 = scalar_lea.vmem %s258_s16, 512  ;;  %s1074_s19 = smov [#allocation6]  }
  0x12   : > { %p922_p8 = scmp.ne.s32.totalorder %s258_s16, %s921_s18  ;;  %s926_s20 = sshll.u32 %s1074_s19, 4  ;;  %s927_s20 = int_to_ptr.vmem [resolvable:$false] %s926_s20 }
  0x13   : > { %s928_s28 = scalar_lea.vmem %s927_s20, 1024  ;;  %p929_p11 = scmp.lt.s32.totalorder %s258_s16, %s927_s20 }
  0x14   : > { %p924_p9 = pnand %p922_p8, %p1352_p7  ;;  %p930_p12 = scmp.lt.s32.totalorder %s928_s28, %s921_s18 }
  0x16   : > { %p925_p10 = pneg %p924_p9  ;;  %p931_p13 = por %p930_p12, %p929_p11 }
  0x18   : > { %p932_p0 = pnand %p931_p13, %p925_p10 }
  0x1a   : > { %935 = shalt.err (!%p932_p0)
}
  0x1b   : > { %s1075_s29 = smov 256   ;;  %s1351_s30 = smov 128  }
  0x1c   : > { %s1077_s8 = smov 8   ;;  %s1187_s10 = sadd.s32 4294967295, %s1072_s26  }
  0x1d   : > { %841 = dma.hbm_to_vmem [thread:$0]  (!%p1170_p6), %s256_s13, 512, %s258_s16, %s1174_s17, %s1075_s29, %s1351_s30, %s1077_s8  }
  0x1e   : > { %p74_p1 = scmp.ne.s32.totalorder %s1056_s22, %s1052_s21  ;;  %p1353_p2 = scmp.eq.s32.totalorder %s1187_s10, 0 }
  0x1f   : > { %p732_p3 = scmp.ge.s32.totalorder %s1072_s26, 1  ;;  %p217_p4 = scmp.lt.s32.totalorder %s1072_s26, 3 }
  0x20   : > { %p1196_p5 = por %p1353_p2, %p74_p1  ;;  %s1078_s13 = smov [#allocation3]  }
  0x21   : > { %p1200_p8 = pnand %p732_p3, %p217_p4  ;;  %s230_s15 = sshll.u32 %s1078_s13, 4  ;;  %s231_s15 = int_to_ptr.vmem [resolvable:$true] %s230_s15 }
  0x22   : > { %s1356_s11 = scalar_select %p1196_p5, 1, 0 }
  0x23   : > { %s738_s16 = sshll.u32 %s249_s7, 7  ;;  %p834_p9 = pneg %p1200_p8 }
  0x24   : > { %s753_s21 = sshll.u32 %s1068_s25, 11  ;;  %s283_s18 = scalar_lea.vmem [#allocation8], %s738_s16 }
  0x25   : > { %s291_s19 = sshll.u32 %s283_s18, 4  ;;  %p835_p10 = pnand %p834_p9, %p1353_p2  ;;  %s1216_s19 = int_to_ptr.vmem [resolvable:$true] %s291_s19 }
  0x26   : > { %s1214_s29 = scalar_lea.hbm %s1348_s4, %s753_s21  ;;  %s947_s30 = scalar_lea.vmem %s231_s15, 128 }
  0x27   : > { %p938_p11 = pneg %p835_p10  ;;  %p948_p12 = scmp.ne.s32.totalorder %s231_s15, %s947_s30 }
  0x28   : > { %p955_p1 = scmp.lt.s32.totalorder %s231_s15, %s231_s15  ;;  %p956_p3 = scmp.lt.s32.totalorder %s947_s30, %s947_s30 }
  0x29   : > { %p950_p13 = pnand %p948_p12, %p938_p11 }
  0x2a   : > { %p957_p4 = por %p956_p3, %p955_p1 }
  0x2b   : > { %p951_p0 = pneg %p950_p13 }
  0x2d   : > { %p958_p7 = pnand %p957_p4, %p951_p0 }
  0x2f   : > { %961 = shalt.err (!%p958_p7)
}
  0x30   : > { %837 = dma.hbm_to_vmem [thread:$0]  (!%p835_p10), %s1344_s0, 128, %s231_s15, [#allocation4]  }
  0x31   : > { %s975_s16 = scalar_lea.vmem %s1216_s19, 2048  ;;  %p1358_p2 = pneg %p1170_p6 }
  0x32   : > { %p976_p9 = scmp.ne.s32.totalorder %s1216_s19, %s975_s16  ;;  %s1079_s21 = smov [#allocation8]  }
  0x33   : > { %s980_s18 = sshll.u32 %s1079_s21, 4  ;;  %s981_s18 = int_to_ptr.vmem [resolvable:$false] %s980_s18 }
  0x34   : > { %p978_p5 = pnand %p976_p9, %p1358_p2  ;;  %s982_s30 = scalar_lea.vmem %s981_s18, 4096 }
  0x35   : > { %p983_p12 = scmp.lt.s32.totalorder %s1216_s19, %s981_s18  ;;  %p984_p7 = scmp.lt.s32.totalorder %s982_s30, %s975_s16 }
  0x36   : > { %p979_p11 = pneg %p978_p5 }
  0x37   : > { %p985_p13 = por %p984_p7, %p983_p12 }
  0x39   : > { %p986_p0 = pnand %p985_p13, %p979_p11 }
  0x3b   : > { %989 = shalt.err (!%p986_p0)
}
  0x3c   : > { %s1359_s20 = smov 128   ;;  %303 = sbr.rel (%p1200_p8) target bundleno = 552 (0x228), region = 44 }
  0x3d   : > { %844 = dma.hbm_to_vmem [thread:$0]  (!%p1170_p6), %s1214_s29, 2048, %s1216_s19, %s1174_s17, %s1359_s20, %s1359_s20, %s1077_s8  }
  0x3e   : > { %p1360_p2 = scmp.eq.s32.totalorder (!%p1200_p8), %s1187_s10, 0 }
  0x41   : > { %1039 = dma.done.wait (%p1360_p2), [#allocation4], 128   ;;  %p1361_p5 = pmov %p1360_p2 }
  0x42   : > { %s309_s14 = sand.u32 1, %s1187_s10   ;;  %s311_s15 = sand.u32 1, %s1056_s22  }
  0x43   : > { %1041 = vsyncadd (%p1361_p5), [#allocation4], 4294967168  ;;  %s743_s28 = sshll.u32 %s311_s15, 5  ;;  %s310_s7 = scalar_lea.sflag [#allocation7], %s309_s14 }
  0x44   : > { %s313_s13 = scalar_lea.vmem [#allocation6], %s743_s28  ;;  %p1362_p10 = scmp.ne.s32.totalorder %s1356_s11, 0 }
  0x46   : > { %1043 = dma.done.wait (%p1362_p10), %s310_s7, 2560  }
  0x47   : > { %1045 = vsyncadd (%p1362_p10), %s310_s7, 4294964736  ;;  %s744_s17 = sshll.u32 %s311_s15, 7  ;;  %p360_p6 = scmp.lt.s32.totalorder %s1064_s24, 1 }
  0x48   : > { %s1259_s30 = scalar_lea.vmem [#allocation8], %s744_s17  ;;  %p745_p8 = scmp.ne.s32.totalorder %s1064_s24, 0 }
  0x49   : > { %s1249_s8 = scalar_select %p360_p6, %s1064_s24, 1 }
  0x4a   : > { %373 = sbr.rel (%p745_p8) target bundleno = 81 (0x51), region = 60 }
  0x4b   : > { %s362_s29 = scalar_lea.vmem %s1346_s2, %s1249_s8  ;;  %s365_s18 = scalar_lea.vmem %s1347_s3, %s1249_s8 }
  0x4f   : > { %v1080_v0 = vmov 0.0  }
  0x50   : > { %374 = vst [vmem:[#allocation2] sm:$0xff] %v1080_v0 }
  0x51 PF: > { %v379_v1 = vld [vmem:[%s313_s13 + $0x18] sm:$0xff]  ;;  %v1081_v2 = vmov 0.0   ;;  %v378_v3 = vld [vmem:[%s313_s13 + $0x10] sm:$0xff]  ;;  %vm1082_vm0 = vmmov 0   ;;  %v377_v4 = vld [vmem:[%s313_s13 + $0x8] sm:$0xff]  ;;  %vm380_vm1 = vcmask 261120   ;;  %v480_v44 = vlaneseq }
  0x52   : > { %776 = vmatprep.subr.mxu0 %v1081_v2  ;;  %784 = vmatprep.mubr.msk.f32.mxu0 %vm1082_vm0, %v1081_v2  ;;  %v376_v5 = vld [vmem:[%s313_s13] sm:$0xff]  ;;  %v375_v6 = vld [vmem:[#allocation3] sm:$0xff]  ;;  %v509_v8 = vld [vmem:[%s1259_s30 + $0x70] sm:$0xff]  ;;  %p747_p1 = scmp.ne.s32.totalorder %s1064_s24, 1 }
  0x53   : > { %777 = vmatpush3.msra.mxu0 %v379_v1  ;;  %787 = vmatprep.subr.mxu1 %v1081_v2  ;;  %v510_v7 = vld [vmem:[%s1259_s30 + $0x78] sm:$0xff]  ;;  %v508_v9 = vld [vmem:[%s1259_s30 + $0x68] sm:$0xff]  ;;  %v507_v10 = vld [vmem:[%s1259_s30 + $0x60] sm:$0xff]  ;;  %v481_v45 = vshrl.u32 %v480_v44, 7 }
  0x54   : > { %778 = vmatprep.subr.mxu0 %v1081_v2  ;;  %819 = vmatprep.mubr.msk.f32.mxu1 %vm1082_vm0, %v1081_v2  ;;  %v506_v11 = vld [vmem:[%s1259_s30 + $0x58] sm:$0xff]  ;;  %v505_v12 = vld [vmem:[%s1259_s30 + $0x50] sm:$0xff]  ;;  %v504_v13 = vld [vmem:[%s1259_s30 + $0x48] sm:$0xff] }
  0x55   : > { %779 = vmatpush3.msra.mxu0 %v378_v3  ;;  %788 = vmatpush3.msra.mxu1 %v510_v7  ;;  %v503_v14 = vld [vmem:[%s1259_s30 + $0x40] sm:$0xff]  ;;  %v502_v15 = vld [vmem:[%s1259_s30 + $0x38] sm:$0xff]  ;;  %v501_v16 = vld [vmem:[%s1259_s30 + $0x30] sm:$0xff]  ;;  %v482_v47 = vsub.s32 0, %v481_v45 }
  0x56   : > { %780 = vmatprep.subr.mxu0 %v1081_v2  ;;  %789 = vmatprep.subr.mxu1 %v1081_v2  ;;  %v500_v17 = vld [vmem:[%s1259_s30 + $0x28] sm:$0xff]  ;;  %v499_v18 = vld [vmem:[%s1259_s30 + $0x20] sm:$0xff]  ;;  %v498_v19 = vld [vmem:[%s1259_s30 + $0x18] sm:$0xff] }
  0x57   : > { %781 = vmatpush3.msra.mxu0 %v377_v4  ;;  %790 = vmatpush3.msra.mxu1 %v509_v8  ;;  %v497_v20 = vld [vmem:[%s1259_s30 + $0x10] sm:$0xff]  ;;  %v496_v21 = vld [vmem:[%s1259_s30 + $0x8] sm:$0xff]  ;;  %v495_v22 = vld [vmem:[%s1259_s30] sm:$0xff] }
  0x58   : > { %782 = vmatprep.subr.mxu0 %v1081_v2  ;;  %791 = vmatprep.subr.mxu1 %v1081_v2  ;;  %v472_v46 = vld [vmem:[%s362_s29] sm:$0x1] }
  0x59   : > { %783 = vmatpush3.msra.mxu0 %v376_v5  ;;  %792 = vmatpush3.msra.mxu1 %v508_v9  ;;  %v476_v50 = vld [vmem:[%s365_s18] sm:$0x1] }
  0x5a   : > { %785 = vmatmul.mubr.msk.f32.vlgmr.msra.gmra.mxu0 %vm380_vm1, %v375_v6  ;;  %793 = vmatprep.subr.mxu1 %v1081_v2  ;;  %v494_v58 = vld [vmem:[#allocation2] sm:$0xff] }
  0x5b   : > { %794 = vmatpush3.msra.mxu1 %v507_v10 }
  0x5c   : > { %795 = vmatprep.subr.mxu1 %v1081_v2 }
  0x5d   : > { %796 = vmatpush3.msra.mxu1 %v506_v11 }
  0x5e   : > { %797 = vmatprep.subr.mxu1 %v1081_v2 }
  0x5f   : > { %798 = vmatpush3.msra.mxu1 %v505_v12 }
  0x60   : > { %799 = vmatprep.subr.mxu1 %v1081_v2 }
  0x61   : > { %800 = vmatpush3.msra.mxu1 %v504_v13 }
  0x62   : > { %801 = vmatprep.subr.mxu1 %v1081_v2 }
  0x63   : > { %802 = vmatpush3.msra.mxu1 %v503_v14 }
  0x64   : > { %803 = vmatprep.subr.mxu1 %v1081_v2 }
  0x65   : > { %804 = vmatpush3.msra.mxu1 %v502_v15 }
  0x66   : > { %805 = vmatprep.subr.mxu1 %v1081_v2 }
  0x67   : > { %806 = vmatpush3.msra.mxu1 %v501_v16 }
  0x68   : > { %807 = vmatprep.subr.mxu1 %v1081_v2 }
  0x69   : > { %808 = vmatpush3.msra.mxu1 %v500_v17 }
  0x6a   : > { %809 = vmatprep.subr.mxu1 %v1081_v2 }
  0x6b   : > { %810 = vmatpush3.msra.mxu1 %v499_v18 }
  0x6c   : > { %811 = vmatprep.subr.mxu1 %v1081_v2 }
  0x6d   : > { %812 = vmatpush3.msra.mxu1 %v498_v19 }
  0x6e   : > { %813 = vmatprep.subr.mxu1 %v1081_v2 }
  0x6f   : > { %814 = vmatpush3.msra.mxu1 %v497_v20 }
  0x70   : > { %815 = vmatprep.subr.mxu1 %v1081_v2 }
  0x71   : > { %816 = vmatpush3.msra.mxu1 %v496_v21 }
  0x72   : > { %817 = vmatprep.subr.mxu1 %v1081_v2 }
  0x73   : > { %818 = vmatpush3.msra.mxu1 %v495_v22 }
 0x11a   : > { %v450_v23 = vpop.f32.mrf.mxu0 }
 0x11b   : > { %v454_v24 = vrot.slane %v450_v23, 4  ;;  %v460_v25 = vmul.f32 %v450_v23, %v450_v23 }
 0x11c   : > { %v786_v26 = vpop.f32.mrf.mxu0 }
 0x11d   : > { %v455_v27 = vadd.f32 %v454_v24, %v450_v23  ;;  %v461_v28 = vrot.slane %v460_v25, 4 }
 0x11f   : > { %v456_v29 = vrot.slane %v455_v27, 2  ;;  %v462_v30 = vadd.f32 %v461_v28, %v460_v25 }
 0x121   : > { %v457_v31 = vadd.f32 %v456_v29, %v455_v27  ;;  %v463_v32 = vrot.slane %v462_v30, 2 }
 0x123   : > { %v458_v33 = vrot.slane %v457_v31, 1  ;;  %v464_v34 = vadd.f32 %v463_v32, %v462_v30 }
 0x125   : > { %v459_v35 = vadd.f32 %v458_v33, %v457_v31  ;;  %v465_v36 = vrot.slane %v464_v34, 1 }
 0x127   : > { %v466_v37 = vadd.f32 %v465_v36, %v464_v34  ;;  %v467_v38 = vmul.f32 0.125, %v459_v35 }
 0x129   : > { %v468_v39 = vmul.f32 0.125, %v466_v37  ;;  %v469_v40 = vmul.f32 %v467_v38, %v467_v38 }
 0x12b   : > { %v470_v41 = vsub.f32 %v468_v39, %v469_v40 }
 0x12d   : > { %v471_v42 = vmax.f32 %v470_v41, 0.0 }
 0x12f   : > { %v473_v43 = vadd.f32 1e-05, %v471_v42 }
 0x131   : > { %906 = vrsqrt.f32 %v473_v43 }
 0x13e   : > { %v907_v48 = vpop.eup %906 }
 0x13f   : > { %v475_v49 = vmul.f32 %v907_v48, %v472_v46 }
 0x141   : > { %v483_v51 = vrot.slane %v475_v49, %v482_v47  ;;  %v477_v52 = vmul.f32 %v475_v49, %v467_v38 }
 0x143   : > { %v478_v53 = vsub.f32 %v476_v50, %v477_v52  ;;  %v485_v54 = vmul.f32 %v483_v51, %v450_v23 }
 0x145   : > { %v490_v55 = vrot.slane %v478_v53, %v482_v47 }
 0x147   : > { %v492_v56 = vadd.f32 %v490_v55, %v485_v54 }
 0x149   : > { %v493_v57 = vmax.f32 %v492_v56, 0.0 }
 0x14b   : > { %820 = vmatmul.mubr.f32.vlgmr.msra.gmra.mxu1 %v493_v57 }
 0x20a   : > { %586 = sbr.rel (%p747_p1) target bundleno = 537 (0x219), region = 64 }
 0x20b   : > { %v577_v59 = vpop.f32.mrf.mxu1 }
 0x20c   : > { %v581_v60 = vadd.f32 %v577_v59, %v494_v58 }
 0x20d   : > { %v821_v61 = vpop.f32.mrf.mxu1 }
 0x20e   : > { %582 = vst [vmem:[#allocation2] sm:$0xff] %v581_v60 }
 0x20f   : > { %v748_v63 = vld [vmem:[%s1349_s5] ss:$0 sm:$0xff] }
 0x215   : > { %v587_v62 = vld [vmem:[#allocation2] sm:$0xff] }
 0x216   : > { %v595_v0 = vadd.f32 %v748_v63, %v587_v62 }
 0x218   : > { %596 = vst [vmem:[#allocation9] sm:$0xff] %v595_v0 }
 0x219 PF: > { %p848_p3 = scmp.eq.s32.totalorder %s1187_s10, 1  ;;  %s1083_s13 = smov [#allocation9]  }
 0x21a   : > { %s606_s17 = sshll.u32 %s1083_s13, 4  ;;  %s607_s17 = int_to_ptr.vmem [resolvable:$true] %s606_s17 }
 0x21b   : > { %s990_s8 = scalar_lea.vmem %s607_s17, 128  ;;  %p997_p12 = scmp.lt.s32.totalorder %s607_s17, %s607_s17 }
 0x21c   : > { %p991_p4 = scmp.ne.s32.totalorder %s607_s17, %s990_s8  ;;  %p998_p7 = scmp.lt.s32.totalorder %s990_s8, %s990_s8 }
 0x21e   : > { %p992_p9 = pnand %p991_p4, %p848_p3  ;;  %p999_p13 = por %p998_p7, %p997_p12 }
 0x220   : > { %p993_p11 = pneg %p992_p9 }
 0x222   : > { %p1000_p0 = pnand %p999_p13, %p993_p11 }
 0x224   : > { %1003 = shalt.err (!%p1000_p0)
}
 0x225   : > { %831 = dma.vmem_to_hbm [thread:$0]  (%p848_p3), %s607_s17, 128, %s1350_s6, [#allocation5]  }
 0x226   : > { %1047 = dma.done.wait (%p848_p3), [#allocation5], 128  }
 0x227   : > { %1049 = vsyncadd (%p848_p3), [#allocation5], 4294967168 }
 0x228 PF: > { %s21_s26 = sadd.s32 1, %s1072_s26   ;;  %s1363_s21 = smov %s1056_s22 }
 0x229   : > { %p18_p2 = scmp.ge.s32.totalorder %s21_s26, 4   ;;  %s1364_s22 = smov %s1060_s23 }
 0x22a   : > { %s1365_s23 = smov %s1163_s9  ;;  %s1366_s24 = smov %s1068_s25 }
 0x22b   : > { %s1367_s25 = smov %s1369_s27  ;;  %20 = sbr.rel (!%p18_p2) target bundleno = 6 (0x6), region = 115 }
 0x230   :  { %619 = vsyncpa [#allocation4], 1 }
 0x231   :  { %621 = vsyncpa [#allocation4 + $0x1], 1 }
 0x232   :  { %622 = vsyncpa [#allocation7], 1 }
 0x233   :  { %624 = vsyncpa [#allocation7 + $0x1], 1 }
 0x234   :  { %625 = vsyncpa [#allocation5], 1 }
 0x235   :  { %627 = vsyncpa [#allocation5 + $0x1], 1 }

</bundles_post_ra>
